<compile_context>
chip_gen: v7x
topology: tpu7x:2x2x1
jax: 0.10.0
libtpu: 0.0.40
codegen_flags: <defaults>
</compile_context>

<pallas_src>
import functools

import jax
import jax.numpy as jnp
from jax.experimental import pallas as pl
from jax.experimental.pallas import tpu as pltpu


def _round_up(x: int, m: int) -> int:
    return ((x + m - 1) // m) * m


def _vmem_capacity_bytes() -> int:
    try:
        return int(getattr(pltpu.get_tpu_info(), "vmem_capacity_bytes"))
    except Exception:
        return 64 * 1024 * 1024  # smallest per-core VMEM (v7x)


def _choose_batch_tile(B: int, C: int, itemsize: int) -> int:
    """Batch tile sized by target logits bytes, rounded to sublane packing."""
    # sublane packing for the streamed dtype: 8 rows (f32), 16 (bf16), 32 (i8)
    pack = max(8, 32 // max(itemsize, 1))
    vmem = _vmem_capacity_bytes()
    # ~2 MiB of logits/tile on small-VMEM parts (v7x), ~4 MiB otherwise.
    target_bytes = (2 * 1024 * 1024) if vmem <= 64 * 1024 * 1024 else (4 * 1024 * 1024)
    tb = target_bytes // max(C * itemsize, 1)
    tb = max(pack, min(4096, tb))
    tb = min(tb, _round_up(B, pack))
    return _round_up(tb, pack)


def _vmem_limit_bytes(tb: int, C: int, itemsize: int) -> int:
    """Scoped-VMEM limit from the real working set, with headroom."""
    vmem = _vmem_capacity_bytes()
    working = (2 * tb * C * itemsize          # double-buffered native logits tile
               + 8 * tb * C * 4               # f32 upcast + elementwise temporaries
               + 8 * tb * 4 * 4)              # (tb,1) targets/alpha_t/out buffers
    limit = int(working * 1.5) + (4 << 20)
    limit = max(limit, 16 << 20)
    limit = min(limit, vmem // 2)             # <=32 MiB on v7x, <=64 MiB on v5e/v6e
    return limit


def _focal_loss_kernel(x_ref, t_ref, at_ref, out_ref, *,
                       gamma: float, label_smoothing: float, n_valid: int):
    x = x_ref[...].astype(jnp.float32)        # (TB, C) logits, upcast per tile
    t = t_ref[...]                            # (TB, 1) int32 targets
    alpha_t = at_ref[...]                     # (TB, 1) f32 alpha[target]

    TB, C = x.shape

    # target indicator as a bool mask (no astype pass); x_t via select + reduce
    col = jax.lax.broadcasted_iota(jnp.int32, (TB, C), 1)
    is_t = col == t                                           # bool (TB, C)
    x_t = jnp.sum(jnp.where(is_t, x, 0.0), axis=1, keepdims=True)  # (TB, 1)

    # numerically stable logsumexp over classes (lane axis)
    m = jnp.max(x, axis=1, keepdims=True)
    lse = jnp.log(jnp.sum(jnp.exp(x - m), axis=1, keepdims=True)) + m  # (TB, 1)

    ls = float(label_smoothing)
    if ls > 0.0:
        # fused CE: -sum(tgt * log_softmax(x)),
        # tgt = onehot*(1-ls) + ls/C, log_softmax(x) = x - lse
        sum_x = jnp.sum(x, axis=1, keepdims=True)
        ce = -(1.0 - ls) * (x_t - lse) - (ls / C) * (sum_x - C * lse)
    else:
        ce = lse - x_t                                         # (TB, 1)

    p_t = jnp.exp(-ce)
    q = 1.0 - p_t
    g = float(gamma)
    if g == 2.0:
        focal = q * q
    elif g == 1.0:
        focal = q
    elif g == 0.0:
        focal = jnp.ones_like(q)
    else:
        focal = jnp.power(jnp.maximum(q, 0.0), jnp.float32(g))

    loss = alpha_t * focal * ce                                # (TB, 1)

    # zero padded rows of the last (ragged) tile so the wrapper sum / slice
    # is exact; natural (TB, 1) column writeback (output bytes are tiny).
    i = pl.program_id(0)
    row = jax.lax.broadcasted_iota(jnp.int32, (TB, 1), 0) + i * TB
    out_ref[...] = jnp.where(row < n_valid, loss, 0.0)


def focal_loss(inputs, targets, alpha=None, gamma: float = 2.0,
               reduction: str = "mean", label_smoothing: float = 0.0):
    """Pallas implementation of FocalLoss.forward.

    inputs:  (B, C) float logits (streamed in native dtype; upcast in-kernel)
    targets: (B,)   int class indices
    alpha:   optional (C,) float per-class weights
    """
    B, C = inputs.shape
    x = inputs                                    # native dtype (bf16-friendly)
    t = jnp.asarray(targets, dtype=jnp.int32).reshape(B, 1)

    # wrapper-side alpha gather: tiny (C,) table -> (B, 1) f32 stream
    if alpha is None:
        at = jnp.ones((B, 1), dtype=jnp.float32)
    else:
        a = jnp.asarray(alpha, dtype=jnp.float32).reshape(C)
        at = jnp.take(a, t[:, 0]).reshape(B, 1).astype(jnp.float32)

    itemsize = jnp.dtype(x.dtype).itemsize
    tb = _choose_batch_tile(B, C, itemsize)
    Bp = _round_up(B, tb)
    if Bp != B:
        x = jnp.pad(x, ((0, Bp - B), (0, 0)))
        t = jnp.pad(t, ((0, Bp - B), (0, 0)))
        at = jnp.pad(at, ((0, Bp - B), (0, 0)))
    n_tiles = Bp // tb

    kernel = functools.partial(
        _focal_loss_kernel,
        gamma=float(gamma),
        label_smoothing=float(label_smoothing),
        n_valid=B,
    )

    in_specs = [
        pl.BlockSpec((tb, C), lambda i: (i, 0)),   # logits tile
        pl.BlockSpec((tb, 1), lambda i: (i, 0)),   # targets tile
        pl.BlockSpec((tb, 1), lambda i: (i, 0)),   # alpha_t tile
    ]
    out_specs = pl.BlockSpec((tb, 1), lambda i: (i, 0))
    out_shape = jax.ShapeDtypeStruct((Bp, 1), jnp.float32)

    per_row = pl.pallas_call(
        kernel,
        grid=(n_tiles,),
        out_shape=out_shape,
        in_specs=in_specs,
        out_specs=out_specs,
        compiler_params=pltpu.CompilerParams(
            dimension_semantics=("parallel",),
            vmem_limit_bytes=_vmem_limit_bytes(tb, C, itemsize),
        ),
    )(x, t, at)

    if reduction == "mean":
        return jnp.sum(per_row) / jnp.float32(B)   # padded rows already zeroed
    if reduction == "sum":
        return jnp.sum(per_row)
    return per_row.reshape(-1)[:B]


def _focal_loss_ref(inputs, targets, alpha, gamma, reduction, label_smoothing):
    """Pure-JAX reference mirroring the PyTorch module."""
    B, C = inputs.shape
    logp = jax.nn.log_softmax(inputs.astype(jnp.float32), axis=1)
    onehot = jax.nn.one_hot(targets, C, dtype=jnp.float32)
    if label_smoothing > 0:
        tgt = onehot * (1 - label_smoothing) + label_smoothing / C
    else:
        tgt = onehot
    ce = -jnp.sum(tgt * logp, axis=1)
    p_t = jnp.exp(-ce)
    focal_term = (1.0 - p_t) ** gamma
    if alpha is not None:
        loss = jnp.asarray(alpha, jnp.float32)[targets] * focal_term * ce
    else:
        loss = focal_term * ce
    if reduction == "mean":
        return loss.mean()
    if reduction == "sum":
        return loss.sum()
    return loss


if __name__ == "__main__":
    key = jax.random.PRNGKey(0)
    k1, k2, k3, k4, k5 = jax.random.split(key, 5)

    # Case 1: mean reduction with alpha + label smoothing (B divides tile).
    B, C = 8, 32
    inputs = jax.random.normal(k1, (B, C), dtype=jnp.float32)
    targets = jax.random.randint(k2, (B,), 0, C, dtype=jnp.int32)
    alpha = jax.random.uniform(k3, (C,), dtype=jnp.float32, minval=0.5, maxval=1.5)

    out = jax.block_until_ready(
        focal_loss(inputs, targets, alpha=alpha, gamma=2.0,
                   reduction="mean", label_smoothing=0.1))
    ref = _focal_loss_ref(inputs, targets, alpha, 2.0, "mean", 0.1)
    assert jnp.allclose(out, ref, rtol=1e-5, atol=1e-5), (out, ref)

    # Case 2: 'none' reduction (natural column writeback path).
    out_none = jax.block_until_ready(
        focal_loss(inputs, targets, alpha=alpha, gamma=2.0,
                   reduction="none", label_smoothing=0.0))
    ref_none = _focal_loss_ref(inputs, targets, alpha, 2.0, "none", 0.0)
    assert out_none.shape == (B,)
    assert jnp.allclose(out_none, ref_none, rtol=1e-5, atol=1e-5)

    # Case 3: ragged batch (padding + masking path), alpha=None, mean.
    B2 = 10
    inputs2 = jax.random.normal(k4, (B2, C), dtype=jnp.float32)
    targets2 = jax.random.randint(k5, (B2,), 0, C, dtype=jnp.int32)
    out2 = jax.block_until_ready(
        focal_loss(inputs2, targets2, alpha=None, gamma=2.0,
                   reduction="mean", label_smoothing=0.0))
    ref2 = _focal_loss_ref(inputs2, targets2, None, 2.0, "mean", 0.0)
    assert jnp.allclose(out2, ref2, rtol=1e-5, atol=1e-5), (out2, ref2)

    # Case 4: sum reduction, non-integer gamma (clamped power path), ragged.
    out3 = jax.block_until_ready(
        focal_loss(inputs2, targets2, alpha=alpha, gamma=1.5,
                   reduction="sum", label_smoothing=0.05))
    ref3 = _focal_loss_ref(inputs2, targets2, alpha, 1.5, "sum", 0.05)
    assert jnp.allclose(out3, ref3, rtol=1e-5, atol=1e-5), (out3, ref3)

    # Case 5: 'none' on the ragged batch (slice check).
    out4 = jax.block_until_ready(
        focal_loss(inputs2, targets2, alpha=alpha, gamma=2.0,
                   reduction="none", label_smoothing=0.0))
    ref4 = _focal_loss_ref(inputs2, targets2, alpha, 2.0, "none", 0.0)
    assert out4.shape == (B2,)
    assert jnp.allclose(out4, ref4, rtol=1e-5, atol=1e-5)

    # Case 6: bf16 logits streamed natively (upcast happens in-kernel).
    inputs_bf = inputs.astype(jnp.bfloat16)
    out_bf = jax.block_until_ready(
        focal_loss(inputs_bf, targets, alpha=alpha, gamma=2.0,
                   reduction="mean", label_smoothing=0.0))
    ref_bf = _focal_loss_ref(inputs_bf, targets, alpha, 2.0, "mean", 0.0)
    assert jnp.allclose(out_bf, ref_bf, rtol=1e-3, atol=1e-3), (out_bf, ref_bf)

    print("KERNEL_OK")
</pallas_src>

<mosaic_0001>
module attributes {stable_mosaic.version = 11 : i64} {
  func.func @_focal_loss_kernel(%arg0: i32, %arg1: memref<8x32xf32, #tpu.memory_space<vmem>>, %arg2: memref<8x1xi32, #tpu.memory_space<vmem>>, %arg3: memref<8x1xf32, #tpu.memory_space<vmem>>, %arg4: memref<8x1xf32, #tpu.memory_space<vmem>>) attributes {dimension_semantics = [#tpu.dimension_semantics<parallel>], iteration_bounds = array<i64: 1>, scalar_prefetch = 0 : i64, scratch_operands = 0 : i64, tpu.core_type = #tpu.core_type<tc>, window_params = [{transform_indices = @transform_0, window_bounds = array<i64: 8, 32>}, {transform_indices = @transform_1, window_bounds = array<i64: 8, 1>}, {transform_indices = @transform_2, window_bounds = array<i64: 8, 1>}, {transform_indices = @transform_3, window_bounds = array<i64: 8, 1>}]} {
    %c0 = arith.constant 0 : index
    %c0_0 = arith.constant 0 : index
    %0 = vector.load %arg1[%c0, %c0_0] : memref<8x32xf32, #tpu.memory_space<vmem>>, vector<8x32xf32>
    %c0_1 = arith.constant 0 : index
    %c0_2 = arith.constant 0 : index
    %1 = vector.load %arg2[%c0_1, %c0_2] : memref<8x1xi32, #tpu.memory_space<vmem>>, vector<8x1xi32>
    %c0_3 = arith.constant 0 : index
    %c0_4 = arith.constant 0 : index
    %2 = vector.load %arg3[%c0_3, %c0_4] : memref<8x1xf32, #tpu.memory_space<vmem>>, vector<8x1xf32>
    %3 = tpu.iota {dimensions = array<i32: 1>} : vector<8x32xi32>
    %4 = vector.broadcast %1 : vector<8x1xi32> to vector<8x32xi32>
    %5 = arith.cmpi eq, %3, %4 : vector<8x32xi32>
    %cst = arith.constant 0.000000e+00 : f32
    %6 = vector.broadcast %cst : f32 to vector<8x32xf32>
    %7 = arith.select %5, %0, %6 : vector<8x32xi1>, vector<8x32xf32>
    %cst_5 = arith.constant dense<0.000000e+00> : vector<8xf32>
    %8 = vector.multi_reduction <add>, %7, %cst_5 [1] : vector<8x32xf32> to vector<8xf32>
    %9 = vector.shape_cast %8 : vector<8xf32> to vector<8x1xf32>
    %cst_6 = arith.constant dense<0xFF800000> : vector<8xf32>
    %10 = vector.multi_reduction <maximumf>, %0, %cst_6 [1] : vector<8x32xf32> to vector<8xf32>
    %11 = vector.shape_cast %10 : vector<8xf32> to vector<8x1xf32>
    %12 = vector.broadcast %11 : vector<8x1xf32> to vector<8x32xf32>
    %13 = arith.subf %0, %12 : vector<8x32xf32>
    %14 = math.exp %13 : vector<8x32xf32>
    %cst_7 = arith.constant dense<0.000000e+00> : vector<8xf32>
    %15 = vector.multi_reduction <add>, %14, %cst_7 [1] : vector<8x32xf32> to vector<8xf32>
    %16 = vector.shape_cast %15 : vector<8xf32> to vector<8x1xf32>
    %17 = math.log %16 : vector<8x1xf32>
    %18 = arith.addf %17, %11 : vector<8x1xf32>
    %cst_8 = arith.constant dense<0.000000e+00> : vector<8xf32>
    %19 = vector.multi_reduction <add>, %0, %cst_8 [1] : vector<8x32xf32> to vector<8xf32>
    %20 = vector.shape_cast %19 : vector<8xf32> to vector<8x1xf32>
    %21 = arith.subf %9, %18 : vector<8x1xf32>
    %cst_9 = arith.constant -0.899999976 : f32
    %22 = vector.broadcast %cst_9 : f32 to vector<8x1xf32>
    %23 = arith.mulf %22, %21 : vector<8x1xf32>
    %cst_10 = arith.constant 3.200000e+01 : f32
    %24 = vector.broadcast %cst_10 : f32 to vector<8x1xf32>
    %25 = arith.mulf %24, %18 : vector<8x1xf32>
    %26 = arith.subf %20, %25 : vector<8x1xf32>
    %cst_11 = arith.constant 3.125000e-03 : f32
    %27 = vector.broadcast %cst_11 : f32 to vector<8x1xf32>
    %28 = arith.mulf %27, %26 : vector<8x1xf32>
    %29 = arith.subf %23, %28 : vector<8x1xf32>
    %cst_12 = arith.constant 0.000000e+00 : f32
    %30 = vector.broadcast %cst_12 : f32 to vector<8x1xf32>
    %31 = arith.subf %30, %29 : vector<8x1xf32>
    %32 = math.exp %31 : vector<8x1xf32>
    %cst_13 = arith.constant 1.000000e+00 : f32
    %33 = vector.broadcast %cst_13 : f32 to vector<8x1xf32>
    %34 = arith.subf %33, %32 : vector<8x1xf32>
    %35 = arith.mulf %34, %34 : vector<8x1xf32>
    %36 = arith.mulf %2, %35 : vector<8x1xf32>
    %37 = arith.mulf %36, %29 : vector<8x1xf32>
    %38 = tpu.iota {dimensions = array<i32: 0>} : vector<8x1xi32>
    %c8_i32 = arith.constant 8 : i32
    %39 = arith.muli %arg0, %c8_i32 : i32
    %40 = vector.broadcast %39 : i32 to vector<8x1xi32>
    %41 = arith.addi %38, %40 : vector<8x1xi32>
    %c8_i32_14 = arith.constant 8 : i32
    %42 = vector.broadcast %c8_i32_14 : i32 to vector<8x1xi32>
    %43 = arith.cmpi slt, %41, %42 : vector<8x1xi32>
    %cst_15 = arith.constant 0.000000e+00 : f32
    %44 = vector.broadcast %cst_15 : f32 to vector<8x1xf32>
    %45 = arith.select %43, %37, %44 : vector<8x1xi1>, vector<8x1xf32>
    %c0_16 = arith.constant 0 : index
    %c0_17 = arith.constant 0 : index
    %46 = vector.load %arg4[%c0_16, %c0_17] : memref<8x1xf32, #tpu.memory_space<vmem>>, vector<8x1xf32>
    tpu.vector_store %arg4[%c0_16, %c0_17], %45 {strides = array<i32>} : memref<8x1xf32, #tpu.memory_space<vmem>>, vector<8x1xf32>,
    return
  }
  func.func @transform_0(%arg0: i32) -> (i32, i32) {
    %c0_i32 = arith.constant 0 : i32
    %c0_i32_0 = arith.constant 0 : i32
    return %arg0, %c0_i32 : i32, i32
  }
  func.func @transform_1(%arg0: i32) -> (i32, i32) {
    %c0_i32 = arith.constant 0 : i32
    %c0_i32_0 = arith.constant 0 : i32
    return %arg0, %c0_i32 : i32, i32
  }
  func.func @transform_2(%arg0: i32) -> (i32, i32) {
    %c0_i32 = arith.constant 0 : i32
    %c0_i32_0 = arith.constant 0 : i32
    return %arg0, %c0_i32 : i32, i32
  }
  func.func @transform_3(%arg0: i32) -> (i32, i32) {
    %c0_i32 = arith.constant 0 : i32
    %c0_i32_0 = arith.constant 0 : i32
    return %arg0, %c0_i32 : i32, i32
  }
}

</mosaic_0001>

<bundles_post_ra>
// kernel: tpu_custom_call.1
= control target key start
LH: loop header
LB: loop body
LE: loop exit
PB: predicated region body
PF: predicated region fallthrough
CT: control target
= control target key end

     0   :  { %vm24_vm0 = vcmask 261120   ;;  %v77_v1 = vmov 0   ;;  %v17_v7 = vlaneseq  ;;  %vm63_vm2 = vcmask 7168   ;;  %s114_s0 = inlined_call_operand.vmem [shape: f32[8,32], index: 0, kind: input, shape index: {}]   ;;  %s115_s1 = inlined_call_operand.vmem [shape: s32[8,1], index: 1, kind: input, shape index: {}]   ;;  %s116_s2 = inlined_call_operand.vmem [shape: f32[8,1], index: 2, kind: input, shape index: {}]   ;;  %s117_s3 = inlined_call_operand.vmem [shape: f32[8,1], index: 3, kind: output, shape index: {}]  }
   0x1   :  { %v14_v0 = vld [vmem:[%s114_s0] sm:$0xff]  ;;  %70 = vset.pattern.permute.xlu0 %v77_v1 }
   0x2   :  { %v28_v2 = vsel %vm24_vm0, %v14_v0, -inf  ;;  %v15_v3 = vld [vmem:[%s115_s1] sm:$0xff]  ;;  %v18_v8 = vand.u32 127, %v17_v7  ;;  %v40_v14 = vsel %vm24_vm0, %v14_v0, 0.0 }
   0x3   :  { %29 = vmax.xlane.f32.xlu0 %v28_v2  ;;  %v16_v31 = vld [vmem:[%s116_s2] sm:$0xff] }
  0x19   :  { %20 = vperm.xlu0 %70, %v15_v3  }
  0x90   :  { %v30_v4 = vpop.xlane.xlu0 %29 }
  0x91   :  { %v31_v5 = vsub.f32 %v14_v0, %v30_v4 }
  0x93   :  { %v32_v6 = vmul.f32 1.442695, %v31_v5 }
  0x95   :  { %71 = vpow2.f32 %v32_v6 }
  0x98   :  { %v21_v9 = vpop.permute.xlu0 %20 }
  0x99   :  { %vm22_vm1 = vcmp.eq.s32.totalorder %v18_v8, %v21_v9 }
  0x9a   :  { %v23_v11 = vsel %vm22_vm1, %v14_v0, 0.0 }
  0x9b   :  { %v25_v13 = vsel %vm24_vm0, %v23_v11, 0.0 }
  0x9f   :  { %v72_v10 = vpop.eup %71 }
  0xa0   :  { %v34_v12 = vsel %vm24_vm0, %v72_v10, 0.0 }
  0xa1   :  { %35 = vadd.xlane.f32.xlu1 %v34_v12 }
  0xa5   :  { %26 = vadd.xlane.f32.xlu1 %v25_v13 }
  0xa9   :  { %41 = vadd.xlane.f32.xlu1 %v40_v14 }
 0x12e   :  { %v36_v15 = vpop.xlane.xlu1 %35 }
 0x12f   :  { %73 = vlog2.f32 %v36_v15 }
 0x132   :  { %v27_v16 = vpop.xlane.xlu1 %26 }
 0x136   :  { %v42_v20 = vpop.xlane.xlu1 %41 }
 0x139   :  { %v74_v17 = vpop.eup %73 }
 0x13a   :  { %v38_v18 = vmul.f32 0.6931472, %v74_v17 }
 0x13c   :  { %v39_v19 = vadd.f32 %v38_v18, %v30_v4 }
 0x13e   :  { %v43_v21 = vsub.f32 %v27_v16, %v39_v19  ;;  %v45_v22 = vmul.f32 32.0, %v39_v19 }
 0x140   :  { %v46_v23 = vsub.f32 %v42_v20, %v45_v22  ;;  %v44_v24 = vmul.f32 -0.9, %v43_v21 }
 0x142   :  { %v47_v25 = vmul.f32 0.003125, %v46_v23 }
 0x144   :  { %v48_v26 = vsub.f32 %v44_v24, %v47_v25 }
 0x146   :  { %v49_v27 = vsub.f32 0.0, %v48_v26 }
 0x148   :  { %v50_v28 = vmul.f32 1.442695, %v49_v27 }
 0x14a   :  { %75 = vpow2.f32 %v50_v28 }
 0x154   :  { %v76_v29 = vpop.eup %75 }
 0x155   :  { %v52_v30 = vsub.f32 1.0, %v76_v29 }
 0x157   :  { %v53_v32 = vmul.f32 %v52_v30, %v52_v30 }
 0x159   :  { %v54_v33 = vmul.f32 %v53_v32, %v16_v31 }
 0x15b   :  { %v55_v34 = vmul.f32 %v54_v33, %v48_v26 }
 0x15d   :  { %64 = vst.msk [vmem:[%s117_s3] sm:$0xff] %vm63_vm2, %v55_v34 }

</bundles_post_ra>
